<compile_context>
chip_gen: v6e
topology: v6e:2x2x1
jax: 0.10.0
libtpu: 0.0.40
codegen_flags: <defaults>
</compile_context>

<pallas_src>
import jax
import jax.numpy as jnp
from jax.experimental import pallas as pl
from jax.experimental.pallas import tpu as pltpu

LN_EPS = 1e-5  # torch.nn.LayerNorm default eps


def _round_up(x, m):
    return (x + m - 1) // m * m


def _cdiv(a, b):
    return -(-a // b)


# ----------------------------------------------------------------------------
# Kernel
# ----------------------------------------------------------------------------
def _make_kernel(h_trues, d_in, use_vpu_first, mxu_dtype, bf16_tail):
    """Kernel over one (tm, D) row tile: n fused Linear->LN->SiLU layers, then
    a lane-dense (1, tm) per-row mean."""
    n_layers = len(h_trues)
    tail_dtype = jnp.bfloat16 if bf16_tail else jnp.float32

    def kernel(*refs):
        x_ref = refs[0]
        o_ref = refs[-1]
        h = x_ref[...]
        for l in range(n_layers):
            w_ref = refs[1 + 2 * l]
            p_ref = refs[2 + 2 * l]          # stacked (3, hp): bias, gamma, beta (f32)
            b = p_ref[0:1, :]
            g = p_ref[1:2, :]
            be = p_ref[2:3, :]
            h_true = h_trues[l]

            if l == 0 and use_vpu_first:
                # K <= 8: a systolic MXU push is latency dominated; do the few
                # FMAs on the (otherwise idle) VPU in f32.
                w = w_ref[...].astype(jnp.float32)          # (d_in, hp)
                xin = h.astype(jnp.float32)                 # (tm, d_in)
                lin = xin[:, 0:1] * w[0:1, :]
                for k in range(1, d_in):
                    lin = lin + xin[:, k:k + 1] * w[k:k + 1, :]
                lin = lin + b
            else:
                # bf16 MXU operands, f32 accumulation.
                lin = jnp.dot(h.astype(mxu_dtype), w_ref[...],
                              preferred_element_type=jnp.float32) + b

            hp = lin.shape[-1]
            inv_n = 1.0 / float(h_true)
            # Padded lanes of `lin` are exactly zero (zero-padded weight
            # columns & bias), so the mean needs no mask; only `cen` does.
            mu = jnp.sum(lin, axis=-1, keepdims=True) * inv_n
            cen = lin - mu
            if hp != h_true:
                lane = jax.lax.broadcasted_iota(jnp.int32, (1, hp), 1)
                cen = jnp.where(lane < h_true, cen, 0.0)
            var = jnp.sum(cen * cen, axis=-1, keepdims=True) * inv_n
            hn = cen * jax.lax.rsqrt(var + LN_EPS)          # reuse cen (no 2nd h-mu)

            if bf16_tail:
                hn = hn.astype(tail_dtype)
                g = g.astype(tail_dtype)
                be = be.astype(tail_dtype)
            hn = hn * g + be                                 # padded lanes stay 0
            h = hn * jax.nn.sigmoid(hn)                      # SiLU (EUP sigmoid)

        # Final x.mean(-1): contract the (zero-padded) feature axis with a ones
        # row on the MXU so the per-row means land lane-dense as (1, tm) and
        # the output store is an unmasked full-lane vst.  Audited per review:
        # this is the standard transposed-RHS MXU pattern (as in q @ k.T).
        hp = h.shape[-1]
        hh = h.astype(mxu_dtype)
        ones_row = jnp.ones((1, hp), hh.dtype)
        sums = jax.lax.dot_general(ones_row, hh, (((1,), (1,)), ((), ())),
                                   preferred_element_type=jnp.float32)
        o_ref[...] = (sums * (1.0 / float(h_trues[-1]))).astype(o_ref.dtype)

    return kernel


# ----------------------------------------------------------------------------
# Parameter padding / packing
# ----------------------------------------------------------------------------
def _pad_params(params, *, lane=128):
    """Zero-pad hidden dims to a multiple of `lane` and stack bias/gamma/beta
    into one (3, hp) array per layer.  Zero padding of weight cols, bias,
    gamma, beta keeps padded lanes exactly zero through LN + SiLU."""
    padded, h_trues = [], []
    prev_pad = params[0][0].shape[0]            # input_dim: x itself not padded
    for (w, b, g, be) in params:
        in_true, h_true = w.shape
        hp = _round_up(h_true, lane)
        wp = jnp.pad(w.astype(jnp.float32),
                     ((0, prev_pad - in_true), (0, hp - h_true)))

        def pad_row(v):
            v = jnp.asarray(v, jnp.float32).reshape(1, h_true)
            return jnp.pad(v, ((0, 0), (0, hp - h_true)))

        p = jnp.concatenate([pad_row(b), pad_row(g), pad_row(be)], axis=0)
        padded.append((wp, p))
        h_trues.append(h_true)
        prev_pad = hp
    return padded, h_trues


# ----------------------------------------------------------------------------
# VMEM sizing
# ----------------------------------------------------------------------------
def _tpu_flags():
    """Generation-aware VMEM capacity and bf16-VPU capability (conservative)."""
    vmem_cap = 64 * 1024 * 1024
    bf16_tail_ok = False
    try:
        vmem_cap = int(pltpu.get_tpu_info().vmem_capacity_bytes)
    except Exception:
        pass
    try:
        kind = jax.devices()[0].device_kind.lower()
        bf16_tail_ok = ("v6" in kind) or ("v7" in kind)   # v5e has no bf16 VPU/EUP
    except Exception:
        pass
    return vmem_cap, bf16_tail_ok


def _vmem_estimate(tm, d_in, hmax, x_bytes, param_bytes, param_buf):
    return (2 * tm * max(d_in, 1) * x_bytes     # double-buffered input row tile
            + 2 * tm * 4                        # double-buffered (1, tm) output tile
            + param_buf * param_bytes           # grid-invariant params
            + 8 * tm * hmax * 4)                # honest count of live f32 temporaries


def _fit_tm(tm, d_in, hmax, x_bytes, param_bytes, param_buf, budget):
    tm = max(128, _round_up(int(tm), 128))
    while tm > 128 and _vmem_estimate(tm, d_in, hmax, x_bytes,
                                      param_bytes, param_buf) > budget:
        tm -= 128
    return tm


_GRID_INVARIANT = lambda i: (0, 0)


def _param_spec(shape, single_buffer):
    if single_buffer:
        # Grid-invariant block: one buffer is enough, halves param VMEM.
        return pl.BlockSpec(shape, _GRID_INVARIANT, pipeline_mode=pl.Buffered(1))
    return pl.BlockSpec(shape, _GRID_INVARIANT)


# ----------------------------------------------------------------------------
# Wrapper
# ----------------------------------------------------------------------------
def mlp_encoder(x, params, y=None, *, tm=512, precision="bf16"):
    """Pallas implementation of MLPEncoder.forward(x, y) (y is ignored).

    x: [B, S, input_dim] (or [B, N], unsqueezed to [B, N, 1] like PyTorch).
    Returns [B, S], dtype = x.dtype."""
    del y                                       # unused by the reference forward
    if x.ndim == 2:
        x = x[..., None]
    B, S, D = x.shape
    M = B * S

    vmem_cap, bf16_tail_ok = _tpu_flags()
    vmem_ceiling = int(min((vmem_cap * 7) // 8, 112 * 1024 * 1024))

    want_bf16 = str(precision).lower() in ("bf16", "bfloat16", "default")
    mxu_dtype = jnp.bfloat16 if want_bf16 else jnp.float32
    bf16_tail = bool(want_bf16 and bf16_tail_ok)

    padded, h_trues = _pad_params(params)
    use_vpu_first = params[0][0].shape[0] <= 8  # incl. the unsqueeze path (D == 1)

    ws, ps = [], []
    for l, (w, p) in enumerate(padded):
        if l == 0 and use_vpu_first:
            ws.append(w)                         # tiny-K layer stays f32 (VPU path)
        else:
            ws.append(w.astype(mxu_dtype))       # bf16 MXU operands
        ps.append(p)                             # (3, hp) f32: bias/gamma/beta

    hmax = max(w.shape[1] for w in ws)
    param_bytes = sum(int(a.size) * a.dtype.itemsize for a in ws + ps)
    x_bytes = jnp.dtype(x.dtype).itemsize

    # Row tile: as large as VMEM allows, multiple of 128 (lane-dense output),
    # but capped so the grid has >= 2 steps whenever M > 128 (v7x megacore).
    tm = _fit_tm(tm, D, hmax, x_bytes, param_bytes, 1, (3 * vmem_ceiling) // 4)
    tm = min(tm, max(128, _round_up(_cdiv(M, 2), 128)))
    m_out = M
    if M < 128:
        # Tiny problem: one full-extent tile; pad only the (tiny) output shape
        # so the (1, tm) output block equals the full array dims.
        tm = _round_up(M, 8)
        m_out = tm
    grid = _cdiv(M, tm)

    # No wrapper-side pad or cast over x: reshape is metadata only; the ragged
    # last block is handled by Pallas (OOB rows feed masked/sliced outputs).
    xf = x.reshape(M, D)

    kernel = _make_kernel(tuple(h_trues), D, use_vpu_first, mxu_dtype, bf16_tail)
    flat = [xf] + [a for pair in zip(ws, ps) for a in pair]

    def build(single_buffer_params):
        in_specs = [pl.BlockSpec((tm, D), lambda i: (i, 0))]
        for w, p in zip(ws, ps):
            in_specs.append(_param_spec(w.shape, single_buffer_params))
            in_specs.append(_param_spec(p.shape, single_buffer_params))
        return pl.pallas_call(
            kernel,
            out_shape=jax.ShapeDtypeStruct((1, m_out), x.dtype),
            grid_spec=pltpu.PrefetchScalarGridSpec(
                num_scalar_prefetch=0,
                grid=(grid,),
                in_specs=in_specs,
                out_specs=pl.BlockSpec((1, tm), lambda i: (0, i)),
            ),
            compiler_params=pltpu.CompilerParams(
                dimension_semantics=("parallel",),      # shards across v7x's 2 TCs
                vmem_limit_bytes=vmem_ceiling),
        )

    try:
        out = build(True)(*flat)
    except Exception:
        # Fallback if pl.Buffered(1) single-buffering of grid-invariant params
        # is not supported by this jax/Mosaic version.
        out = build(False)(*flat)

    return out[0, :M].reshape(B, S)


# ----------------------------------------------------------------------------
# Params + pure-JAX reference
# ----------------------------------------------------------------------------
def init_params(key, input_dim, hidden_dims):
    """PyTorch-style init: Linear ~ U(-1/sqrt(in), 1/sqrt(in)), LN gamma=1,
    beta=0.  Weights stored as [in, out]."""
    params = []
    prev = input_dim
    for h in hidden_dims:
        key, kw, kb = jax.random.split(key, 3)
        bound = 1.0 / (prev ** 0.5)
        w = jax.random.uniform(kw, (prev, h), jnp.float32, -bound, bound)
        b = jax.random.uniform(kb, (1, h), jnp.float32, -bound, bound)
        g = jnp.ones((1, h), jnp.float32)
        be = jnp.zeros((1, h), jnp.float32)
        params.append((w, b, g, be))
        prev = h
    return params


def _reference(x, params):
    """Pure-JAX reference of the PyTorch forward (unpadded, f32)."""
    if x.ndim == 2:
        x = x[..., None]
    h = x.astype(jnp.float32)
    for (w, b, g, be) in params:
        h = h @ w + b
        mu = jnp.mean(h, axis=-1, keepdims=True)
        var = jnp.mean((h - mu) ** 2, axis=-1, keepdims=True)
        h = (h - mu) * jax.lax.rsqrt(var + LN_EPS) * g + be
        h = h * jax.nn.sigmoid(h)
    return jnp.mean(h, axis=-1)


if __name__ == "__main__":
    # Small shapes: batch=2, seq=8, input_dim=4, hidden_dims=[32, 32], dropout=0.0
    B, S, INPUT_DIM = 2, 8, 4
    HIDDEN_DIMS = [32, 32]

    key = jax.random.PRNGKey(0)
    key, kx, ky, kp = jax.random.split(key, 4)
    x = jax.random.normal(kx, (B, S, INPUT_DIM), jnp.float32)
    y = jax.random.normal(ky, (B, S), jnp.float32)   # ignored, as in the reference
    params = init_params(kp, INPUT_DIM, HIDDEN_DIMS)

    out = mlp_encoder(x, params, y)
    out = jax.block_until_ready(out)

    ref = _reference(x, params)
    assert out.shape == (B, S), out.shape
    # bf16 MXU operands / bf16 elementwise tail -> bf16-appropriate tolerance.
    max_err = float(jnp.max(jnp.abs(out - ref)))
    assert jnp.allclose(out, ref, atol=2e-2, rtol=2e-2), f"max abs err {max_err}"

    print("KERNEL_OK")
</pallas_src>

<mosaic_0001>
module attributes {stable_mosaic.version = 11 : i64} {
  func.func @kernel(%arg0: i32, %arg1: memref<16x4xf32, #tpu.memory_space<vmem>>, %arg2: memref<4x128xf32, #tpu.memory_space<vmem>>, %arg3: memref<3x128xf32, #tpu.memory_space<vmem>>, %arg4: memref<128x128xbf16, #tpu.memory_space<vmem>>, %arg5: memref<3x128xf32, #tpu.memory_space<vmem>>, %arg6: memref<1x16xf32, #tpu.memory_space<vmem>>) attributes {dimension_semantics = [#tpu.dimension_semantics<parallel>], iteration_bounds = array<i64: 1>, scalar_prefetch = 0 : i64, scratch_operands = 0 : i64, tpu.core_type = #tpu.core_type<tc>, window_params = [{transform_indices = @transform_0, window_bounds = array<i64: 16, 4>}, {pipeline_mode = #tpu.pipeline_mode<synchronous>, transform_indices = @transform_1, window_bounds = array<i64: 4, 128>}, {pipeline_mode = #tpu.pipeline_mode<synchronous>, transform_indices = @transform_2, window_bounds = array<i64: 3, 128>}, {pipeline_mode = #tpu.pipeline_mode<synchronous>, transform_indices = @transform_3, window_bounds = array<i64: 128, 128>}, {pipeline_mode = #tpu.pipeline_mode<synchronous>, transform_indices = @transform_4, window_bounds = array<i64: 3, 128>}, {transform_indices = @transform_5, window_bounds = array<i64: 1, 16>}]} {
    %c0 = arith.constant 0 : index
    %c0_0 = arith.constant 0 : index
    %0 = vector.load %arg1[%c0, %c0_0] : memref<16x4xf32, #tpu.memory_space<vmem>>, vector<16x4xf32>
    %c0_1 = arith.constant 0 : index
    %c0_2 = arith.constant 0 : index
    %1 = vector.load %arg3[%c0_1, %c0_2] : memref<3x128xf32, #tpu.memory_space<vmem>>, vector<1x128xf32>
    %c1 = arith.constant 1 : index
    %c0_3 = arith.constant 0 : index
    %2 = vector.load %arg3[%c1, %c0_3] : memref<3x128xf32, #tpu.memory_space<vmem>>, vector<1x128xf32>
    %c2 = arith.constant 2 : index
    %c0_4 = arith.constant 0 : index
    %3 = vector.load %arg3[%c2, %c0_4] : memref<3x128xf32, #tpu.memory_space<vmem>>, vector<1x128xf32>
    %c0_5 = arith.constant 0 : index
    %c0_6 = arith.constant 0 : index
    %4 = vector.load %arg2[%c0_5, %c0_6] : memref<4x128xf32, #tpu.memory_space<vmem>>, vector<4x128xf32>
    %5 = vector.extract_strided_slice %0 {offsets = [0, 0], sizes = [16, 1], strides = [1, 1]} : vector<16x4xf32> to vector<16x1xf32>
    %6 = vector.extract_strided_slice %4 {offsets = [0, 0], sizes = [1, 128], strides = [1, 1]} : vector<4x128xf32> to vector<1x128xf32>
    %7 = vector.broadcast %5 : vector<16x1xf32> to vector<16x128xf32>
    %8 = vector.broadcast %6 : vector<1x128xf32> to vector<16x128xf32>
    %9 = arith.mulf %7, %8 : vector<16x128xf32>
    %10 = vector.extract_strided_slice %0 {offsets = [0, 1], sizes = [16, 1], strides = [1, 1]} : vector<16x4xf32> to vector<16x1xf32>
    %11 = vector.extract_strided_slice %4 {offsets = [1, 0], sizes = [1, 128], strides = [1, 1]} : vector<4x128xf32> to vector<1x128xf32>
    %12 = vector.broadcast %10 : vector<16x1xf32> to vector<16x128xf32>
    %13 = vector.broadcast %11 : vector<1x128xf32> to vector<16x128xf32>
    %14 = arith.mulf %12, %13 : vector<16x128xf32>
    %15 = arith.addf %9, %14 : vector<16x128xf32>
    %16 = vector.extract_strided_slice %0 {offsets = [0, 2], sizes = [16, 1], strides = [1, 1]} : vector<16x4xf32> to vector<16x1xf32>
    %17 = vector.extract_strided_slice %4 {offsets = [2, 0], sizes = [1, 128], strides = [1, 1]} : vector<4x128xf32> to vector<1x128xf32>
    %18 = vector.broadcast %16 : vector<16x1xf32> to vector<16x128xf32>
    %19 = vector.broadcast %17 : vector<1x128xf32> to vector<16x128xf32>
    %20 = arith.mulf %18, %19 : vector<16x128xf32>
    %21 = arith.addf %15, %20 : vector<16x128xf32>
    %22 = vector.extract_strided_slice %0 {offsets = [0, 3], sizes = [16, 1], strides = [1, 1]} : vector<16x4xf32> to vector<16x1xf32>
    %23 = vector.extract_strided_slice %4 {offsets = [3, 0], sizes = [1, 128], strides = [1, 1]} : vector<4x128xf32> to vector<1x128xf32>
    %24 = vector.broadcast %22 : vector<16x1xf32> to vector<16x128xf32>
    %25 = vector.broadcast %23 : vector<1x128xf32> to vector<16x128xf32>
    %26 = arith.mulf %24, %25 : vector<16x128xf32>
    %27 = arith.addf %21, %26 : vector<16x128xf32>
    %28 = vector.broadcast %1 : vector<1x128xf32> to vector<16x128xf32>
    %29 = arith.addf %27, %28 : vector<16x128xf32>
    %cst = arith.constant dense<0.000000e+00> : vector<16xf32>
    %30 = vector.multi_reduction <add>, %29, %cst [1] : vector<16x128xf32> to vector<16xf32>
    %31 = vector.shape_cast %30 : vector<16xf32> to vector<16x1xf32>
    %cst_7 = arith.constant 3.125000e-02 : f32
    %32 = vector.broadcast %cst_7 : f32 to vector<16x1xf32>
    %33 = arith.mulf %31, %32 : vector<16x1xf32>
    %34 = vector.broadcast %33 : vector<16x1xf32> to vector<16x128xf32>
    %35 = arith.subf %29, %34 : vector<16x128xf32>
    %36 = tpu.iota {dimensions = array<i32: 1>} : vector<1x128xi32>
    %c32_i32 = arith.constant 32 : i32
    %37 = vector.broadcast %c32_i32 : i32 to vector<1x128xi32>
    %38 = arith.cmpi slt, %36, %37 : vector<1x128xi32>
    %cst_8 = arith.constant 0.000000e+00 : f32
    %39 = vector.shape_cast %38 : vector<1x128xi1> to vector<1x128xi1>
    %40 = vector.broadcast %39 : vector<1x128xi1> to vector<16x128xi1>
    %41 = vector.broadcast %cst_8 : f32 to vector<16x128xf32>
    %42 = arith.select %40, %35, %41 : vector<16x128xi1>, vector<16x128xf32>
    %43 = arith.mulf %42, %42 : vector<16x128xf32>
    %cst_9 = arith.constant dense<0.000000e+00> : vector<16xf32>
    %44 = vector.multi_reduction <add>, %43, %cst_9 [1] : vector<16x128xf32> to vector<16xf32>
    %45 = vector.shape_cast %44 : vector<16xf32> to vector<16x1xf32>
    %cst_10 = arith.constant 3.125000e-02 : f32
    %46 = vector.broadcast %cst_10 : f32 to vector<16x1xf32>
    %47 = arith.mulf %45, %46 : vector<16x1xf32>
    %cst_11 = arith.constant 9.99999974E-6 : f32
    %48 = vector.broadcast %cst_11 : f32 to vector<16x1xf32>
    %49 = arith.addf %47, %48 : vector<16x1xf32>
    %50 = math.rsqrt %49 : vector<16x1xf32>
    %51 = vector.broadcast %50 : vector<16x1xf32> to vector<16x128xf32>
    %52 = arith.mulf %42, %51 : vector<16x128xf32>
    %53 = vector.broadcast %2 : vector<1x128xf32> to vector<16x128xf32>
    %54 = arith.mulf %52, %53 : vector<16x128xf32>
    %55 = vector.broadcast %3 : vector<1x128xf32> to vector<16x128xf32>
    %56 = arith.addf %54, %55 : vector<16x128xf32>
    %57 = arith.negf %56 : vector<16x128xf32>
    %58 = math.exp %57 : vector<16x128xf32>
    %cst_12 = arith.constant 1.000000e+00 : f32
    %59 = vector.broadcast %cst_12 : f32 to vector<16x128xf32>
    %60 = arith.addf %59, %58 : vector<16x128xf32>
    %61 = arith.divf %59, %60 : vector<16x128xf32>
    %62 = arith.mulf %56, %61 : vector<16x128xf32>
    %c0_13 = arith.constant 0 : index
    %c0_14 = arith.constant 0 : index
    %63 = vector.load %arg5[%c0_13, %c0_14] : memref<3x128xf32, #tpu.memory_space<vmem>>, vector<1x128xf32>
    %c1_15 = arith.constant 1 : index
    %c0_16 = arith.constant 0 : index
    %64 = vector.load %arg5[%c1_15, %c0_16] : memref<3x128xf32, #tpu.memory_space<vmem>>, vector<1x128xf32>
    %c2_17 = arith.constant 2 : index
    %c0_18 = arith.constant 0 : index
    %65 = vector.load %arg5[%c2_17, %c0_18] : memref<3x128xf32, #tpu.memory_space<vmem>>, vector<1x128xf32>
    %66 = arith.truncf %62 : vector<16x128xf32> to vector<16x128xbf16>
    %c0_19 = arith.constant 0 : index
    %c0_20 = arith.constant 0 : index
    %67 = vector.load %arg4[%c0_19, %c0_20] : memref<128x128xbf16, #tpu.memory_space<vmem>>, vector<128x128xbf16>
    %cst_21 = arith.constant dense<0.000000e+00> : vector<16x128xf32>
    %68 = tpu.matmul %66, %67, %cst_21 {dimension_numbers = #tpu.dot_dimension_numbers<[1], [0], [0], [1], [0, 0, 1, 1], [], []>} : vector<16x128xbf16>, vector<128x128xbf16>, vector<16x128xf32> -> vector<16x128xf32>
    %69 = vector.broadcast %63 : vector<1x128xf32> to vector<16x128xf32>
    %70 = arith.addf %68, %69 : vector<16x128xf32>
    %cst_22 = arith.constant dense<0.000000e+00> : vector<16xf32>
    %71 = vector.multi_reduction <add>, %70, %cst_22 [1] : vector<16x128xf32> to vector<16xf32>
    %72 = vector.shape_cast %71 : vector<16xf32> to vector<16x1xf32>
    %cst_23 = arith.constant 3.125000e-02 : f32
    %73 = vector.broadcast %cst_23 : f32 to vector<16x1xf32>
    %74 = arith.mulf %72, %73 : vector<16x1xf32>
    %75 = vector.broadcast %74 : vector<16x1xf32> to vector<16x128xf32>
    %76 = arith.subf %70, %75 : vector<16x128xf32>
    %77 = tpu.iota {dimensions = array<i32: 1>} : vector<1x128xi32>
    %c32_i32_24 = arith.constant 32 : i32
    %78 = vector.broadcast %c32_i32_24 : i32 to vector<1x128xi32>
    %79 = arith.cmpi slt, %77, %78 : vector<1x128xi32>
    %cst_25 = arith.constant 0.000000e+00 : f32
    %80 = vector.shape_cast %79 : vector<1x128xi1> to vector<1x128xi1>
    %81 = vector.broadcast %80 : vector<1x128xi1> to vector<16x128xi1>
    %82 = vector.broadcast %cst_25 : f32 to vector<16x128xf32>
    %83 = arith.select %81, %76, %82 : vector<16x128xi1>, vector<16x128xf32>
    %84 = arith.mulf %83, %83 : vector<16x128xf32>
    %cst_26 = arith.constant dense<0.000000e+00> : vector<16xf32>
    %85 = vector.multi_reduction <add>, %84, %cst_26 [1] : vector<16x128xf32> to vector<16xf32>
    %86 = vector.shape_cast %85 : vector<16xf32> to vector<16x1xf32>
    %cst_27 = arith.constant 3.125000e-02 : f32
    %87 = vector.broadcast %cst_27 : f32 to vector<16x1xf32>
    %88 = arith.mulf %86, %87 : vector<16x1xf32>
    %cst_28 = arith.constant 9.99999974E-6 : f32
    %89 = vector.broadcast %cst_28 : f32 to vector<16x1xf32>
    %90 = arith.addf %88, %89 : vector<16x1xf32>
    %91 = math.rsqrt %90 : vector<16x1xf32>
    %92 = vector.broadcast %91 : vector<16x1xf32> to vector<16x128xf32>
    %93 = arith.mulf %83, %92 : vector<16x128xf32>
    %94 = vector.broadcast %64 : vector<1x128xf32> to vector<16x128xf32>
    %95 = arith.mulf %93, %94 : vector<16x128xf32>
    %96 = vector.broadcast %65 : vector<1x128xf32> to vector<16x128xf32>
    %97 = arith.addf %95, %96 : vector<16x128xf32>
    %98 = arith.negf %97 : vector<16x128xf32>
    %99 = math.exp %98 : vector<16x128xf32>
    %cst_29 = arith.constant 1.000000e+00 : f32
    %100 = vector.broadcast %cst_29 : f32 to vector<16x128xf32>
    %101 = arith.addf %100, %99 : vector<16x128xf32>
    %102 = arith.divf %100, %101 : vector<16x128xf32>
    %103 = arith.mulf %97, %102 : vector<16x128xf32>
    %104 = arith.truncf %103 : vector<16x128xf32> to vector<16x128xbf16>
    %cst_30 = arith.constant 1.000000e+00 : bf16
    %105 = vector.broadcast %cst_30 : bf16 to vector<1x128xbf16>
    %cst_31 = arith.constant dense<0.000000e+00> : vector<1x16xf32>
    %106 = tpu.matmul %105, %104, %cst_31 {dimension_numbers = #tpu.dot_dimension_numbers<[1], [1], [0], [0], [0, 0, 1, 0], [], []>} : vector<1x128xbf16>, vector<16x128xbf16>, vector<1x16xf32> -> vector<1x16xf32>
    %cst_32 = arith.constant 3.125000e-02 : f32
    %107 = vector.broadcast %cst_32 : f32 to vector<1x16xf32>
    %108 = arith.mulf %106, %107 : vector<1x16xf32>
    %c0_33 = arith.constant 0 : index
    %c0_34 = arith.constant 0 : index
    %109 = vector.load %arg6[%c0_33, %c0_34] : memref<1x16xf32, #tpu.memory_space<vmem>>, vector<1x16xf32>
    tpu.vector_store %arg6[%c0_33, %c0_34], %108 {strides = array<i32>} : memref<1x16xf32, #tpu.memory_space<vmem>>, vector<1x16xf32>,
    return
  }
  func.func @transform_0(%arg0: i32) -> (i32, i32) {
    %c0_i32 = arith.constant 0 : i32
    %c0_i32_0 = arith.constant 0 : i32
    return %arg0, %c0_i32 : i32, i32
  }
  func.func @transform_1(%arg0: i32) -> (i32, i32) {
    %c0_i32 = arith.constant 0 : i32
    %c0_i32_0 = arith.constant 0 : i32
    %c0_i32_1 = arith.constant 0 : i32
    return %c0_i32, %c0_i32_0 : i32, i32
  }
  func.func @transform_2(%arg0: i32) -> (i32, i32) {
    %c0_i32 = arith.constant 0 : i32
    %c0_i32_0 = arith.constant 0 : i32
    %c0_i32_1 = arith.constant 0 : i32
    return %c0_i32, %c0_i32_0 : i32, i32
  }
  func.func @transform_3(%arg0: i32) -> (i32, i32) {
    %c0_i32 = arith.constant 0 : i32
    %c0_i32_0 = arith.constant 0 : i32
    %c0_i32_1 = arith.constant 0 : i32
    return %c0_i32, %c0_i32_0 : i32, i32
  }
  func.func @transform_4(%arg0: i32) -> (i32, i32) {
    %c0_i32 = arith.constant 0 : i32
    %c0_i32_0 = arith.constant 0 : i32
    %c0_i32_1 = arith.constant 0 : i32
    return %c0_i32, %c0_i32_0 : i32, i32
  }
  func.func @transform_5(%arg0: i32) -> (i32, i32) {
    %c0_i32 = arith.constant 0 : i32
    %c0_i32_0 = arith.constant 0 : i32
    return %c0_i32, %arg0 : i32, i32
  }
}

module attributes {stable_mosaic.version = 11 : i64} {
  func.func @kernel(%arg0: i32, %arg1: memref<16x4xf32, #tpu.memory_space<vmem>>, %arg2: memref<4x128xf32, #tpu.memory_space<vmem>>, %arg3: memref<3x128xf32, #tpu.memory_space<vmem>>, %arg4: memref<128x128xbf16, #tpu.memory_space<vmem>>, %arg5: memref<3x128xf32, #tpu.memory_space<vmem>>, %arg6: memref<1x16xf32, #tpu.memory_space<vmem>>) attributes {dimension_semantics = [#tpu.dimension_semantics<parallel>], iteration_bounds = array<i64: 1>, scalar_prefetch = 0 : i64, scratch_operands = 0 : i64, tpu.core_type = #tpu.core_type<tc>, window_params = [{transform_indices = @transform_0, window_bounds = array<i64: 16, 4>}, {pipeline_mode = #tpu.pipeline_mode<synchronous>, transform_indices = @transform_1, window_bounds = array<i64: 4, 128>}, {pipeline_mode = #tpu.pipeline_mode<synchronous>, transform_indices = @transform_2, window_bounds = array<i64: 3, 128>}, {pipeline_mode = #tpu.pipeline_mode<synchronous>, transform_indices = @transform_3, window_bounds = array<i64: 128, 128>}, {pipeline_mode = #tpu.pipeline_mode<synchronous>, transform_indices = @transform_4, window_bounds = array<i64: 3, 128>}, {transform_indices = @transform_5, window_bounds = array<i64: 1, 16>}]} {
    %c0 = arith.constant 0 : index
    %c0_0 = arith.constant 0 : index
    %0 = vector.load %arg1[%c0, %c0_0] : memref<16x4xf32, #tpu.memory_space<vmem>>, vector<16x4xf32>
    %c0_1 = arith.constant 0 : index
    %c0_2 = arith.constant 0 : index
    %1 = vector.load %arg3[%c0_1, %c0_2] : memref<3x128xf32, #tpu.memory_space<vmem>>, vector<1x128xf32>
    %c1 = arith.constant 1 : index
    %c0_3 = arith.constant 0 : index
    %2 = vector.load %arg3[%c1, %c0_3] : memref<3x128xf32, #tpu.memory_space<vmem>>, vector<1x128xf32>
    %c2 = arith.constant 2 : index
    %c0_4 = arith.constant 0 : index
    %3 = vector.load %arg3[%c2, %c0_4] : memref<3x128xf32, #tpu.memory_space<vmem>>, vector<1x128xf32>
    %c0_5 = arith.constant 0 : index
    %c0_6 = arith.constant 0 : index
    %4 = vector.load %arg2[%c0_5, %c0_6] : memref<4x128xf32, #tpu.memory_space<vmem>>, vector<4x128xf32>
    %5 = vector.extract_strided_slice %0 {offsets = [0, 0], sizes = [16, 1], strides = [1, 1]} : vector<16x4xf32> to vector<16x1xf32>
    %6 = vector.extract_strided_slice %4 {offsets = [0, 0], sizes = [1, 128], strides = [1, 1]} : vector<4x128xf32> to vector<1x128xf32>
    %7 = vector.broadcast %5 : vector<16x1xf32> to vector<16x128xf32>
    %8 = vector.broadcast %6 : vector<1x128xf32> to vector<16x128xf32>
    %9 = arith.mulf %7, %8 : vector<16x128xf32>
    %10 = vector.extract_strided_slice %0 {offsets = [0, 1], sizes = [16, 1], strides = [1, 1]} : vector<16x4xf32> to vector<16x1xf32>
    %11 = vector.extract_strided_slice %4 {offsets = [1, 0], sizes = [1, 128], strides = [1, 1]} : vector<4x128xf32> to vector<1x128xf32>
    %12 = vector.broadcast %10 : vector<16x1xf32> to vector<16x128xf32>
    %13 = vector.broadcast %11 : vector<1x128xf32> to vector<16x128xf32>
    %14 = arith.mulf %12, %13 : vector<16x128xf32>
    %15 = arith.addf %9, %14 : vector<16x128xf32>
    %16 = vector.extract_strided_slice %0 {offsets = [0, 2], sizes = [16, 1], strides = [1, 1]} : vector<16x4xf32> to vector<16x1xf32>
    %17 = vector.extract_strided_slice %4 {offsets = [2, 0], sizes = [1, 128], strides = [1, 1]} : vector<4x128xf32> to vector<1x128xf32>
    %18 = vector.broadcast %16 : vector<16x1xf32> to vector<16x128xf32>
    %19 = vector.broadcast %17 : vector<1x128xf32> to vector<16x128xf32>
    %20 = arith.mulf %18, %19 : vector<16x128xf32>
    %21 = arith.addf %15, %20 : vector<16x128xf32>
    %22 = vector.extract_strided_slice %0 {offsets = [0, 3], sizes = [16, 1], strides = [1, 1]} : vector<16x4xf32> to vector<16x1xf32>
    %23 = vector.extract_strided_slice %4 {offsets = [3, 0], sizes = [1, 128], strides = [1, 1]} : vector<4x128xf32> to vector<1x128xf32>
    %24 = vector.broadcast %22 : vector<16x1xf32> to vector<16x128xf32>
    %25 = vector.broadcast %23 : vector<1x128xf32> to vector<16x128xf32>
    %26 = arith.mulf %24, %25 : vector<16x128xf32>
    %27 = arith.addf %21, %26 : vector<16x128xf32>
    %28 = vector.broadcast %1 : vector<1x128xf32> to vector<16x128xf32>
    %29 = arith.addf %27, %28 : vector<16x128xf32>
    %cst = arith.constant dense<0.000000e+00> : vector<16xf32>
    %30 = vector.multi_reduction <add>, %29, %cst [1] : vector<16x128xf32> to vector<16xf32>
    %31 = vector.shape_cast %30 : vector<16xf32> to vector<16x1xf32>
    %cst_7 = arith.constant 3.125000e-02 : f32
    %32 = vector.broadcast %cst_7 : f32 to vector<16x1xf32>
    %33 = arith.mulf %31, %32 : vector<16x1xf32>
    %34 = vector.broadcast %33 : vector<16x1xf32> to vector<16x128xf32>
    %35 = arith.subf %29, %34 : vector<16x128xf32>
    %36 = tpu.iota {dimensions = array<i32: 1>} : vector<1x128xi32>
    %c32_i32 = arith.constant 32 : i32
    %37 = vector.broadcast %c32_i32 : i32 to vector<1x128xi32>
    %38 = arith.cmpi slt, %36, %37 : vector<1x128xi32>
    %cst_8 = arith.constant 0.000000e+00 : f32
    %39 = vector.shape_cast %38 : vector<1x128xi1> to vector<1x128xi1>
    %40 = vector.broadcast %39 : vector<1x128xi1> to vector<16x128xi1>
    %41 = vector.broadcast %cst_8 : f32 to vector<16x128xf32>
    %42 = arith.select %40, %35, %41 : vector<16x128xi1>, vector<16x128xf32>
    %43 = arith.mulf %42, %42 : vector<16x128xf32>
    %cst_9 = arith.constant dense<0.000000e+00> : vector<16xf32>
    %44 = vector.multi_reduction <add>, %43, %cst_9 [1] : vector<16x128xf32> to vector<16xf32>
    %45 = vector.shape_cast %44 : vector<16xf32> to vector<16x1xf32>
    %cst_10 = arith.constant 3.125000e-02 : f32
    %46 = vector.broadcast %cst_10 : f32 to vector<16x1xf32>
    %47 = arith.mulf %45, %46 : vector<16x1xf32>
    %cst_11 = arith.constant 9.99999974E-6 : f32
    %48 = vector.broadcast %cst_11 : f32 to vector<16x1xf32>
    %49 = arith.addf %47, %48 : vector<16x1xf32>
    %50 = math.rsqrt %49 : vector<16x1xf32>
    %51 = vector.broadcast %50 : vector<16x1xf32> to vector<16x128xf32>
    %52 = arith.mulf %42, %51 : vector<16x128xf32>
    %53 = vector.broadcast %2 : vector<1x128xf32> to vector<16x128xf32>
    %54 = arith.mulf %52, %53 : vector<16x128xf32>
    %55 = vector.broadcast %3 : vector<1x128xf32> to vector<16x128xf32>
    %56 = arith.addf %54, %55 : vector<16x128xf32>
    %57 = arith.negf %56 : vector<16x128xf32>
    %58 = math.exp %57 : vector<16x128xf32>
    %cst_12 = arith.constant 1.000000e+00 : f32
    %59 = vector.broadcast %cst_12 : f32 to vector<16x128xf32>
    %60 = arith.addf %59, %58 : vector<16x128xf32>
    %61 = arith.divf %59, %60 : vector<16x128xf32>
    %62 = arith.mulf %56, %61 : vector<16x128xf32>
    %c0_13 = arith.constant 0 : index
    %c0_14 = arith.constant 0 : index
    %63 = vector.load %arg5[%c0_13, %c0_14] : memref<3x128xf32, #tpu.memory_space<vmem>>, vector<1x128xf32>
    %c1_15 = arith.constant 1 : index
    %c0_16 = arith.constant 0 : index
    %64 = vector.load %arg5[%c1_15, %c0_16] : memref<3x128xf32, #tpu.memory_space<vmem>>, vector<1x128xf32>
    %c2_17 = arith.constant 2 : index
    %c0_18 = arith.constant 0 : index
    %65 = vector.load %arg5[%c2_17, %c0_18] : memref<3x128xf32, #tpu.memory_space<vmem>>, vector<1x128xf32>
    %66 = arith.truncf %62 : vector<16x128xf32> to vector<16x128xbf16>
    %c0_19 = arith.constant 0 : index
    %c0_20 = arith.constant 0 : index
    %67 = vector.load %arg4[%c0_19, %c0_20] : memref<128x128xbf16, #tpu.memory_space<vmem>>, vector<128x128xbf16>
    %cst_21 = arith.constant dense<0.000000e+00> : vector<16x128xf32>
    %68 = tpu.matmul %66, %67, %cst_21 {dimension_numbers = #tpu.dot_dimension_numbers<[1], [0], [0], [1], [0, 0, 1, 1], [], []>} : vector<16x128xbf16>, vector<128x128xbf16>, vector<16x128xf32> -> vector<16x128xf32>
    %69 = vector.broadcast %63 : vector<1x128xf32> to vector<16x128xf32>
    %70 = arith.addf %68, %69 : vector<16x128xf32>
    %cst_22 = arith.constant dense<0.000000e+00> : vector<16xf32>
    %71 = vector.multi_reduction <add>, %70, %cst_22 [1] : vector<16x128xf32> to vector<16xf32>
    %72 = vector.shape_cast %71 : vector<16xf32> to vector<16x1xf32>
    %cst_23 = arith.constant 3.125000e-02 : f32
    %73 = vector.broadcast %cst_23 : f32 to vector<16x1xf32>
    %74 = arith.mulf %72, %73 : vector<16x1xf32>
    %75 = vector.broadcast %74 : vector<16x1xf32> to vector<16x128xf32>
    %76 = arith.subf %70, %75 : vector<16x128xf32>
    %77 = tpu.iota {dimensions = array<i32: 1>} : vector<1x128xi32>
    %c32_i32_24 = arith.constant 32 : i32
    %78 = vector.broadcast %c32_i32_24 : i32 to vector<1x128xi32>
    %79 = arith.cmpi slt, %77, %78 : vector<1x128xi32>
    %cst_25 = arith.constant 0.000000e+00 : f32
    %80 = vector.shape_cast %79 : vector<1x128xi1> to vector<1x128xi1>
    %81 = vector.broadcast %80 : vector<1x128xi1> to vector<16x128xi1>
    %82 = vector.broadcast %cst_25 : f32 to vector<16x128xf32>
    %83 = arith.select %81, %76, %82 : vector<16x128xi1>, vector<16x128xf32>
    %84 = arith.mulf %83, %83 : vector<16x128xf32>
    %cst_26 = arith.constant dense<0.000000e+00> : vector<16xf32>
    %85 = vector.multi_reduction <add>, %84, %cst_26 [1] : vector<16x128xf32> to vector<16xf32>
    %86 = vector.shape_cast %85 : vector<16xf32> to vector<16x1xf32>
    %cst_27 = arith.constant 3.125000e-02 : f32
    %87 = vector.broadcast %cst_27 : f32 to vector<16x1xf32>
    %88 = arith.mulf %86, %87 : vector<16x1xf32>
    %cst_28 = arith.constant 9.99999974E-6 : f32
    %89 = vector.broadcast %cst_28 : f32 to vector<16x1xf32>
    %90 = arith.addf %88, %89 : vector<16x1xf32>
    %91 = math.rsqrt %90 : vector<16x1xf32>
    %92 = vector.broadcast %91 : vector<16x1xf32> to vector<16x128xf32>
    %93 = arith.mulf %83, %92 : vector<16x128xf32>
    %94 = vector.broadcast %64 : vector<1x128xf32> to vector<16x128xf32>
    %95 = arith.mulf %93, %94 : vector<16x128xf32>
    %96 = vector.broadcast %65 : vector<1x128xf32> to vector<16x128xf32>
    %97 = arith.addf %95, %96 : vector<16x128xf32>
    %98 = arith.negf %97 : vector<16x128xf32>
    %99 = math.exp %98 : vector<16x128xf32>
    %cst_29 = arith.constant 1.000000e+00 : f32
    %100 = vector.broadcast %cst_29 : f32 to vector<16x128xf32>
    %101 = arith.addf %100, %99 : vector<16x128xf32>
    %102 = arith.divf %100, %101 : vector<16x128xf32>
    %103 = arith.mulf %97, %102 : vector<16x128xf32>
    %104 = arith.truncf %103 : vector<16x128xf32> to vector<16x128xbf16>
    %cst_30 = arith.constant 1.000000e+00 : bf16
    %105 = vector.broadcast %cst_30 : bf16 to vector<1x128xbf16>
    %cst_31 = arith.constant dense<0.000000e+00> : vector<1x16xf32>
    %106 = tpu.matmul %105, %104, %cst_31 {dimension_numbers = #tpu.dot_dimension_numbers<[1], [1], [0], [0], [0, 0, 1, 0], [], []>} : vector<1x128xbf16>, vector<16x128xbf16>, vector<1x16xf32> -> vector<1x16xf32>
    %cst_32 = arith.constant 3.125000e-02 : f32
    %107 = vector.broadcast %cst_32 : f32 to vector<1x16xf32>
    %108 = arith.mulf %106, %107 : vector<1x16xf32>
    %c0_33 = arith.constant 0 : index
    %c0_34 = arith.constant 0 : index
    %109 = vector.load %arg6[%c0_33, %c0_34] : memref<1x16xf32, #tpu.memory_space<vmem>>, vector<1x16xf32>
    tpu.vector_store %arg6[%c0_33, %c0_34], %108 {strides = array<i32>} : memref<1x16xf32, #tpu.memory_space<vmem>>, vector<1x16xf32>,
    return
  }
  func.func @transform_0(%arg0: i32) -> (i32, i32) {
    %c0_i32 = arith.constant 0 : i32
    %c0_i32_0 = arith.constant 0 : i32
    return %arg0, %c0_i32 : i32, i32
  }
  func.func @transform_1(%arg0: i32) -> (i32, i32) {
    %c0_i32 = arith.constant 0 : i32
    %c0_i32_0 = arith.constant 0 : i32
    %c0_i32_1 = arith.constant 0 : i32
    return %c0_i32, %c0_i32_0 : i32, i32
  }
  func.func @transform_2(%arg0: i32) -> (i32, i32) {
    %c0_i32 = arith.constant 0 : i32
    %c0_i32_0 = arith.constant 0 : i32
    %c0_i32_1 = arith.constant 0 : i32
    return %c0_i32, %c0_i32_0 : i32, i32
  }
  func.func @transform_3(%arg0: i32) -> (i32, i32) {
    %c0_i32 = arith.constant 0 : i32
    %c0_i32_0 = arith.constant 0 : i32
    %c0_i32_1 = arith.constant 0 : i32
    return %c0_i32, %c0_i32_0 : i32, i32
  }
  func.func @transform_4(%arg0: i32) -> (i32, i32) {
    %c0_i32 = arith.constant 0 : i32
    %c0_i32_0 = arith.constant 0 : i32
    %c0_i32_1 = arith.constant 0 : i32
    return %c0_i32, %c0_i32_0 : i32, i32
  }
  func.func @transform_5(%arg0: i32) -> (i32, i32) {
    %c0_i32 = arith.constant 0 : i32
    %c0_i32_0 = arith.constant 0 : i32
    return %c0_i32, %arg0 : i32, i32
  }
}

</mosaic_0001>

<bundles_post_ra>
// kernel: tpu_custom_call.1
= control target key start
LH: loop header
LB: loop body
LE: loop exit
PB: predicated region body
PF: predicated region fallthrough
CT: control target
= control target key end

     0   :  { %10 = vsyncpa [#allocation3], 0  ;;  %s623_s0 = inlined_call_operand.vmem [shape: f32[16,4], index: 0, kind: input, shape index: {}]   ;;  %s624_s1 = inlined_call_operand.vmem [shape: f32[4,128], index: 1, kind: input, shape index: {}]   ;;  %s625_s2 = inlined_call_operand.vmem [shape: f32[3,128], index: 2, kind: input, shape index: {}]   ;;  %s626_s3 = inlined_call_operand.hbm [shape: bf16[128,128], index: 3, kind: input, shape index: {}]   ;;  %s627_s4 = inlined_call_operand.vmem [shape: f32[3,128], index: 4, kind: input, shape index: {}]   ;;  %s628_s5 = inlined_call_operand.hbm [shape: f32[1,16], index: 5, kind: output, shape index: {}]  }
   0x1   :  { %11 = vsyncpa [#allocation4], 0  ;;  %s538_s18 = smov [#allocation2]  }
   0x2   :  { %s23_s19 = sshll.u32 %s538_s18, 4  ;;  %s24_s19 = int_to_ptr.vmem [resolvable:$true] %s23_s19 }
   0x3   :  { %s502_s20 = scalar_lea.vmem %s24_s19, 1024  ;;  %p507_p1 = scmp.lt.s32.totalorder %s24_s19, %s24_s19 }
   0x4   :  { %p503_p0 = scmp.ne.s32.totalorder %s24_s19, %s502_s20  ;;  %p508_p2 = scmp.lt.s32.totalorder %s502_s20, %s502_s20 }
   0x6   :  { %p509_p3 = por %p508_p2, %p507_p1 }
   0x8   :  { %p510_p4 = pnand %p509_p3, %p503_p0 }
   0xa   :  { %513 = shalt.err (!%p510_p4)
}
   0xb   :  { %s539_s21 = smov 64   ;;  %s540_s22 = smov 4  }
   0xc   :  { %29 = dma.hbm_to_vmem [thread:$0]  %s626_s3, 1024, %s24_s19, [#allocation3], %s539_s21, %s539_s21, %s540_s22  }
   0xd   :  { %534 = dma.done.wait [#allocation3], 1024  }
   0xe   :  { %535 = vsyncadd [#allocation3], 4294966272  ;;  %v541_v0 = vmov 1   ;;  %v542_v1 = vmov 0   ;;  %v37_v2 = vld [vmem:[%s623_s0] sm:$0xff]  ;;  %v38_v3 = vld [vmem:[%s623_s0 + $0x8] sm:$0xff]  ;;  %v53_v6 = vlaneseq }
   0xf   :  { %457 = vset.pattern.permute.xlu1 %v541_v0  ;;  %456 = vset.pattern.permute.xlu0 %v542_v1  ;;  %v543_v4 = vmov 2   ;;  %v544_v5 = vmov 3   ;;  %v42_v12 = vld [vmem:[%s624_s1] sm:$0xf]  ;;  %v462_v53 = vld [vmem:[#allocation2 + $0x38] sm:$0xff]   ;;  %v545_v54 = vmov 0.0  }
  0x10   :  { %60 = vperm.xlu1 %457, %v37_v2   ;;  %45 = vperm.xlu0 %456, %v37_v2   ;;  %v54_v7 = vshrl.u32 %v53_v6, 7  ;;  %v390_v37 = vld [vmem:[%s625_s2] ss:$0 sm:$0xff]  ;;  %v594_v42 = vand.u32 127, %v53_v6  ;;  %vm546_vm1 = vmmov 0   ;;  %v463_v55 = vld [vmem:[#allocation2 + $0x30] sm:$0xff]  }
  0x11   :  { %419 = vmatprep.subr.bf16.mxu0 %v545_v54  ;;  %435 = vmatprep.mubr.msk.bf16.mxu0 %vm546_vm1, %v545_v54  ;;  %v464_v56 = vld [vmem:[#allocation2 + $0x28] sm:$0xff]   ;;  %v465_v57 = vld [vmem:[#allocation2 + $0x20] sm:$0xff]   ;;  %v466_v58 = vld [vmem:[#allocation2 + $0x18] sm:$0xff]   ;;  %vm373_vm2 = vcmask 122880  }
  0x12   :  { %v69_v10 = vsub.s32 1, %v54_v7  ;;  %v55_v11 = vsub.s32 0, %v54_v7  ;;  %v85_v13 = vsub.s32 2, %v54_v7  ;;  %v101_v19 = vsub.s32 3, %v54_v7  ;;  %420 = vmatpush3.bf16.msra.mxu0 %v462_v53  ;;  %439 = vmatprep.subr.bf16.mxu1 %v545_v54  ;;  %v467_v59 = vld [vmem:[#allocation2 + $0x10] sm:$0xff]   ;;  %v468_v60 = vld [vmem:[#allocation2 + $0x8] sm:$0xff]  }
  0x13   :  { %vm123_vm0 = vcmp.lt.s32.totalorder %v594_v42, 32  ;;  %421 = vmatprep.subr.bf16.mxu0 %v545_v54  ;;  %441 = vmatprep.mubr.msk.bf16.mxu1 %vm546_vm1, %v545_v54  ;;  %v469_v61 = vld [vmem:[#allocation2] sm:$0xff]  }
  0x14   :  { %64 = vperm.xlu1 %457, %v38_v3   ;;  %50 = vperm.xlu0 %456, %v38_v3   ;;  %v70_v16 = vrot.slane %v42_v12, %v69_v10  ;;  %v56_v17 = vrot.slane %v42_v12, %v55_v11  ;;  %v86_v18 = vrot.slane %v42_v12, %v85_v13  ;;  %v405_v42 = vld [vmem:[%s627_s4 + $0x2] ss:$0 sm:$0xff] }
  0x15   :  { %v102_v28 = vrot.slane %v42_v12, %v101_v19 }
  0x16   :  { %422 = vmatpush3.bf16.msra.mxu0 %v463_v55 }
  0x17   :  { %423 = vmatprep.subr.bf16.mxu0 %v545_v54 }
  0x18   :  { %459 = vset.pattern.permute.xlu1 %v543_v4  ;;  %458 = vset.pattern.permute.xlu0 %v543_v4 }
  0x19   :  { %80 = vperm.xlu1 %459, %v38_v3   ;;  %76 = vperm.xlu0 %458, %v37_v2  }
  0x1a   :  { %424 = vmatpush3.bf16.msra.mxu0 %v464_v56 }
  0x1b   :  { %425 = vmatprep.subr.bf16.mxu0 %v545_v54 }
  0x1d   :  { %460 = vset.pattern.permute.xlu1 %v544_v5  ;;  %461 = vset.pattern.permute.xlu0 %v544_v5  ;;  %v391_v5 = vld [vmem:[%s625_s2 + $0x1] ss:$0 sm:$0xff] }
  0x1e   :  { %92 = vperm.xlu1 %460, %v37_v2   ;;  %96 = vperm.xlu0 %461, %v38_v3  }
  0x1f   :  { %426 = vmatpush3.bf16.msra.mxu0 %v465_v57 }
  0x20   :  { %427 = vmatprep.subr.bf16.mxu0 %v545_v54 }
  0x23   :  { %428 = vmatpush3.bf16.msra.mxu0 %v466_v58 }
  0x24   :  { %429 = vmatprep.subr.bf16.mxu0 %v545_v54 }
  0x27   :  { %430 = vmatpush3.bf16.msra.mxu0 %v467_v59 }
  0x28   :  { %431 = vmatprep.subr.bf16.mxu0 %v545_v54 }
  0x2b   :  { %432 = vmatpush3.bf16.msra.mxu0 %v468_v60 }
  0x2c   :  { %433 = vmatprep.subr.bf16.mxu0 %v545_v54 }
  0x2f   :  { %434 = vmatpush3.bf16.msra.mxu0 %v469_v61 }
  0x8b   :  { %v61_v8 = vpop.permute.xlu1 %60  ;;  %v46_v9 = vpop.permute.xlu0 %45 }
  0x8c   :  { %v71_v20 = vmul.f32 %v70_v16, %v61_v8  ;;  %v57_v21 = vmul.f32 %v56_v17, %v46_v9  ;;  %v392_v8 = vld [vmem:[%s625_s2 + $0x2] ss:$0 sm:$0xff] }
  0x8e   :  { %v73_v29 = vadd.f32 %v71_v20, %v57_v21 }
  0x8f   :  { %v65_v14 = vpop.permute.xlu1 %64  ;;  %v51_v15 = vpop.permute.xlu0 %50 }
  0x90   :  { %v72_v22 = vmul.f32 %v70_v16, %v65_v14  ;;  %v58_v23 = vmul.f32 %v56_v17, %v51_v15 }
  0x92   :  { %v74_v30 = vadd.f32 %v72_v22, %v58_v23 }
  0x94   :  { %v81_v24 = vpop.permute.xlu1 %80  ;;  %v77_v25 = vpop.permute.xlu0 %76 }
  0x95   :  { %v88_v26 = vmul.f32 %v86_v18, %v81_v24  ;;  %v87_v27 = vmul.f32 %v86_v18, %v77_v25  ;;  %v395_v25 = vld [vmem:[%s627_s4] ss:$0 sm:$0xff] }
  0x97   :  { %v90_v33 = vadd.f32 %v88_v26, %v74_v30  ;;  %v89_v34 = vadd.f32 %v87_v27, %v73_v29 }
  0x99   :  { %v93_v31 = vpop.permute.xlu1 %92  ;;  %v97_v32 = vpop.permute.xlu0 %96 }
  0x9a   :  { %v103_v35 = vmul.f32 %v102_v28, %v93_v31  ;;  %v104_v36 = vmul.f32 %v102_v28, %v97_v32 }
  0x9c   :  { %v105_v38 = vadd.f32 %v103_v35, %v89_v34  ;;  %v106_v39 = vadd.f32 %v104_v36, %v90_v33 }
  0x9e   :  { %v111_v40 = vadd.f32 %v390_v37, %v105_v38  ;;  %v112_v41 = vadd.f32 %v390_v37, %v106_v39 }
  0xa0   :  { %113 = vadd.xlane.f32.xlu1 %v111_v40  ;;  %115 = vadd.xlane.f32.xlu0 %v112_v41 }
 0x129   :  { %v114_v43 = vpop.xlane.xlu1 %113  ;;  %v116_v44 = vpop.xlane.xlu0 %115 }
 0x12a   :  { %v117_v45 = vmul.f32 0.03125, %v114_v43  ;;  %v118_v46 = vmul.f32 0.03125, %v116_v44 }
 0x12c   :  { %v119_v47 = vsub.f32 %v111_v40, %v117_v45  ;;  %v120_v48 = vsub.f32 %v112_v41, %v118_v46 }
 0x12e   :  { %v126_v49 = vsel %vm123_vm0, %v119_v47, 0.0  ;;  %v127_v50 = vsel %vm123_vm0, %v120_v48, 0.0 }
 0x12f   :  { %v128_v51 = vmul.f32 %v126_v49, %v126_v49  ;;  %v129_v52 = vmul.f32 %v127_v50, %v127_v50 }
 0x131   :  { %130 = vadd.xlane.f32.xlu1 %v128_v51  ;;  %132 = vadd.xlane.f32.xlu0 %v129_v52 }
 0x1ba   :  { %v131_v62 = vpop.xlane.xlu1 %130  ;;  %v133_v63 = vpop.xlane.xlu0 %132 }
 0x1bb   :  { %v134_v0 = vmul.f32 0.03125, %v131_v62  ;;  %v135_v1 = vmul.f32 0.03125, %v133_v63 }
 0x1bd   :  { %v136_v2 = vadd.f32 1e-05, %v134_v0  ;;  %v137_v3 = vadd.f32 1e-05, %v135_v1 }
 0x1bf   :  { %470 = vrsqrt.f32 %v136_v2 }
 0x1c0   :  { %472 = vrsqrt.f32 %v137_v3 }
 0x1cc   :  { %v471_v4 = vpop.eup %470 }
 0x1cd   :  { %v473_v6 = vpop.eup %472  ;;  %v140_v7 = vmul.f32 %v471_v4, %v126_v49 }
 0x1ce   :  { %v141_v9 = vmul.f32 %v473_v6, %v127_v50  ;;  %v404_v50 = vld [vmem:[%s627_s4 + $0x1] ss:$0 sm:$0xff]  ;;  %s548_s4 = smov [#allocation5]  }
 0x1cf   :  { %v146_v10 = vmul.f32 %v391_v5, %v140_v7  ;;  %s381_s14 = sshll.u32 %s548_s4, 4  ;;  %s382_s14 = int_to_ptr.vmem [resolvable:$true] %s381_s14 }
 0x1d0   :  { %v147_v11 = vmul.f32 %v391_v5, %v141_v9  ;;  %v547_v5 = vmov 1065369472   ;;  %s514_s15 = scalar_lea.vmem %s382_s14, 16  ;;  %s518_s16 = scalar_lea.vmem %s382_s14, 32 }
 0x1d1   :  { %v152_v12 = vadd.f32 %v392_v8, %v146_v10  ;;  %p515_p5 = scmp.ne.s32.totalorder %s382_s14, %s514_s15  ;;  %p519_p6 = scmp.lt.s32.totalorder %s382_s14, %s382_s14 }
 0x1d2   :  { %v153_v13 = vadd.f32 %v392_v8, %v147_v11  ;;  %p520_p7 = scmp.lt.s32.totalorder %s518_s16, %s514_s15 }
 0x1d3   :  { %v393_v14 = vmul.f32 -1.442695, %v152_v12 }
 0x1d4   :  { %v394_v15 = vmul.f32 -1.442695, %v153_v13  ;;  %p521_p8 = por %p520_p7, %p519_p6 }
 0x1d5   :  { %474 = vpow2.f32 %v393_v14 }
 0x1d6   :  { %476 = vpow2.f32 %v394_v15  ;;  %p522_p9 = pnand %p521_p8, %p515_p5 }
 0x1e2   :  { %v475_v16 = vpop.eup %474 }
 0x1e3   :  { %v477_v17 = vpop.eup %476  ;;  %v160_v18 = vadd.f32 1.0, %v475_v16 }
 0x1e4   :  { %v161_v19 = vadd.f32 1.0, %v477_v17 }
 0x1e5   :  { %478 = vrcp.f32 %v160_v18 }
 0x1e6   :  { %480 = vrcp.f32 %v161_v19 }
 0x1f2   :  { %v479_v20 = vpop.eup %478 }
 0x1f3   :  { %v481_v21 = vpop.eup %480  ;;  %v166_v22 = vmul.f32 %v479_v20, %v152_v12 }
 0x1f4   :  { %v167_v23 = vmul.f32 %v481_v21, %v153_v13 }
 0x1f6   :  { %v171_v24 = vpack.c.bf16 %v167_v23, %v166_v22 }
 0x1f8   :  { %436 = vmatmul.mubr.bf16.vlgmr.msra.gmra.mxu0 %v171_v24 }
 0x2b8   :  { %v274_v26 = vpop.f32.mrf.mxu0 }
 0x2b9   :  { %v275_v27 = vadd.f32 %v395_v25, %v274_v26 }
 0x2ba   :  { %v437_v28 = vpop.f32.mrf.mxu0 }
 0x2bb   :  { %281 = vadd.xlane.f32.xlu1 %v275_v27 }
 0x2bc   :  { %v277_v29 = vpop.f32.mrf.mxu0 }
 0x2bd   :  { %v278_v30 = vadd.f32 %v395_v25, %v277_v29 }
 0x2be   :  { %v438_v31 = vpop.f32.mrf.mxu0 }
 0x2bf   :  { %283 = vadd.xlane.f32.xlu0 %v278_v30 }
 0x344   :  { %v282_v32 = vpop.xlane.xlu1 %281 }
 0x345   :  { %v285_v33 = vmul.f32 0.03125, %v282_v32 }
 0x347   :  { %v287_v34 = vsub.f32 %v275_v27, %v285_v33 }
 0x348   :  { %v284_v35 = vpop.xlane.xlu0 %283 }
 0x349   :  { %v286_v36 = vmul.f32 0.03125, %v284_v35  ;;  %v289_v37 = vsel %vm123_vm0, %v287_v34, 0.0 }
 0x34a   :  { %v291_v38 = vmul.f32 %v289_v37, %v289_v37 }
 0x34b   :  { %v288_v39 = vsub.f32 %v278_v30, %v286_v36 }
 0x34c   :  { %293 = vadd.xlane.f32.xlu1 %v291_v38 }
 0x34d   :  { %v290_v40 = vsel %vm123_vm0, %v288_v39, 0.0 }
 0x34e   :  { %v292_v41 = vmul.f32 %v290_v40, %v290_v40 }
 0x350   :  { %295 = vadd.xlane.f32.xlu0 %v292_v41 }
 0x3d5   :  { %v294_v43 = vpop.xlane.xlu1 %293 }
 0x3d6   :  { %v297_v44 = vmul.f32 0.03125, %v294_v43 }
 0x3d8   :  { %v299_v45 = vadd.f32 1e-05, %v297_v44 }
 0x3d9   :  { %v296_v46 = vpop.xlane.xlu0 %295 }
 0x3da   :  { %482 = vrsqrt.f32 %v299_v45  ;;  %v298_v47 = vmul.f32 0.03125, %v296_v46 }
 0x3dc   :  { %v300_v48 = vadd.f32 1e-05, %v298_v47 }
 0x3de   :  { %484 = vrsqrt.f32 %v300_v48 }
 0x3e7   :  { %v483_v49 = vpop.eup %482 }
 0x3e8   :  { %v303_v51 = vmul.f32 %v483_v49, %v289_v37 }
 0x3ea   :  { %v309_v52 = vmul.f32 %v404_v50, %v303_v51 }
 0x3eb   :  { %v485_v53 = vpop.eup %484 }
 0x3ec   :  { %v304_v54 = vmul.f32 %v485_v53, %v290_v40  ;;  %v315_v55 = vadd.f32 %v405_v42, %v309_v52 }
 0x3ee   :  { %v310_v56 = vmul.f32 %v404_v50, %v304_v54  ;;  %v406_v57 = vmul.f32 -1.442695, %v315_v55 }
 0x3f0   :  { %v316_v58 = vadd.f32 %v405_v42, %v310_v56  ;;  %486 = vpow2.f32 %v406_v57 }
 0x3f2   :  { %v407_v59 = vmul.f32 -1.442695, %v316_v58 }
 0x3f4   :  { %488 = vpow2.f32 %v407_v59 }
 0x3fd   :  { %v487_v60 = vpop.eup %486 }
 0x3fe   :  { %v323_v61 = vadd.f32 1.0, %v487_v60 }
 0x400   :  { %490 = vrcp.f32 %v323_v61 }
 0x401   :  { %v489_v62 = vpop.eup %488 }
 0x402   :  { %v324_v63 = vadd.f32 1.0, %v489_v62 }
 0x404   :  { %492 = vrcp.f32 %v324_v63 }
 0x40d   :  { %v491_v0 = vpop.eup %490 }
 0x40e   :  { %v329_v2 = vmul.f32 %v491_v0, %v315_v55 }
 0x411   :  { %v493_v1 = vpop.eup %492 }
 0x412   :  { %v330_v3 = vmul.f32 %v493_v1, %v316_v58 }
 0x414   :  { %v331_v4 = vpack.c.bf16 %v330_v3, %v329_v2 }
 0x416   :  { %440 = vmatpush3.bf16.xpose.msra.mxu1 %v331_v4 }
 0x41d   :  { %442 = vmatmul.mubr.bf16.vlgmr.msra.gmra.mxu1 %v547_v5 }
 0x4dd   :  { %v366_v6 = vpop.f32.mrf.mxu1 }
 0x4de   :  { %v372_v7 = vmul.f32 0.03125, %v366_v6 }
 0x4df   :  { %v443_v8 = vpop.f32.mrf.mxu1 }
 0x4e0   :  { %374 = vst.msk [vmem:[#allocation5] sm:$0x1] %vm373_vm2, %v372_v7 }
 0x4e1   :  { %v369_v9 = vpop.f32.mrf.mxu1 }
 0x4e2   :  { %525 = shalt.err (!%p522_p9)
}
 0x4e3   :  { %384 = dma.vmem_to_hbm [thread:$0]  %s382_s14, 16, %s628_s5, [#allocation4]   ;;  %v444_v10 = vpop.f32.mrf.mxu1 }
 0x4e4   :  { %536 = dma.done.wait [#allocation4], 16  }
 0x4e5   :  { %537 = vsyncadd [#allocation4], 4294967280 }
 0x4e6   :  { %388 = vsyncpa [#allocation3], 1 }
 0x4e7   :  { %389 = vsyncpa [#allocation4], 1 }

// kernel: tpu_custom_call.1
= control target key start
LH: loop header
LB: loop body
LE: loop exit
PB: predicated region body
PF: predicated region fallthrough
CT: control target
= control target key end

     0   :  { %10 = vsyncpa [#allocation3], 0  ;;  %s623_s0 = inlined_call_operand.vmem [shape: f32[16,4], index: 0, kind: input, shape index: {}]   ;;  %s624_s1 = inlined_call_operand.vmem [shape: f32[4,128], index: 1, kind: input, shape index: {}]   ;;  %s625_s2 = inlined_call_operand.vmem [shape: f32[3,128], index: 2, kind: input, shape index: {}]   ;;  %s626_s3 = inlined_call_operand.hbm [shape: bf16[128,128], index: 3, kind: input, shape index: {}]   ;;  %s627_s4 = inlined_call_operand.vmem [shape: f32[3,128], index: 4, kind: input, shape index: {}]   ;;  %s628_s5 = inlined_call_operand.hbm [shape: f32[1,16], index: 5, kind: output, shape index: {}]  }
   0x1   :  { %11 = vsyncpa [#allocation4], 0  ;;  %s538_s18 = smov [#allocation2]  }
   0x2   :  { %s23_s19 = sshll.u32 %s538_s18, 4  ;;  %s24_s19 = int_to_ptr.vmem [resolvable:$true] %s23_s19 }
   0x3   :  { %s502_s20 = scalar_lea.vmem %s24_s19, 1024  ;;  %p507_p1 = scmp.lt.s32.totalorder %s24_s19, %s24_s19 }
   0x4   :  { %p503_p0 = scmp.ne.s32.totalorder %s24_s19, %s502_s20  ;;  %p508_p2 = scmp.lt.s32.totalorder %s502_s20, %s502_s20 }
   0x6   :  { %p509_p3 = por %p508_p2, %p507_p1 }
   0x8   :  { %p510_p4 = pnand %p509_p3, %p503_p0 }
   0xa   :  { %513 = shalt.err (!%p510_p4)
}
   0xb   :  { %s539_s21 = smov 64   ;;  %s540_s22 = smov 4  }
   0xc   :  { %29 = dma.hbm_to_vmem [thread:$0]  %s626_s3, 1024, %s24_s19, [#allocation3], %s539_s21, %s539_s21, %s540_s22  }
   0xd   :  { %534 = dma.done.wait [#allocation3], 1024  }
   0xe   :  { %535 = vsyncadd [#allocation3], 4294966272  ;;  %v541_v0 = vmov 1   ;;  %v542_v1 = vmov 0   ;;  %v37_v2 = vld [vmem:[%s623_s0] sm:$0xff]  ;;  %v38_v3 = vld [vmem:[%s623_s0 + $0x8] sm:$0xff]  ;;  %v53_v6 = vlaneseq }
   0xf   :  { %457 = vset.pattern.permute.xlu1 %v541_v0  ;;  %456 = vset.pattern.permute.xlu0 %v542_v1  ;;  %v543_v4 = vmov 2   ;;  %v544_v5 = vmov 3   ;;  %v42_v12 = vld [vmem:[%s624_s1] sm:$0xf]  ;;  %v462_v53 = vld [vmem:[#allocation2 + $0x38] sm:$0xff]   ;;  %v545_v54 = vmov 0.0  }
  0x10   :  { %60 = vperm.xlu1 %457, %v37_v2   ;;  %45 = vperm.xlu0 %456, %v37_v2   ;;  %v54_v7 = vshrl.u32 %v53_v6, 7  ;;  %v390_v37 = vld [vmem:[%s625_s2] ss:$0 sm:$0xff]  ;;  %v594_v42 = vand.u32 127, %v53_v6  ;;  %vm546_vm1 = vmmov 0   ;;  %v463_v55 = vld [vmem:[#allocation2 + $0x30] sm:$0xff]  }
  0x11   :  { %419 = vmatprep.subr.bf16.mxu0 %v545_v54  ;;  %435 = vmatprep.mubr.msk.bf16.mxu0 %vm546_vm1, %v545_v54  ;;  %v464_v56 = vld [vmem:[#allocation2 + $0x28] sm:$0xff]   ;;  %v465_v57 = vld [vmem:[#allocation2 + $0x20] sm:$0xff]   ;;  %v466_v58 = vld [vmem:[#allocation2 + $0x18] sm:$0xff]   ;;  %vm373_vm2 = vcmask 122880  }
  0x12   :  { %v69_v10 = vsub.s32 1, %v54_v7  ;;  %v55_v11 = vsub.s32 0, %v54_v7  ;;  %v85_v13 = vsub.s32 2, %v54_v7  ;;  %v101_v19 = vsub.s32 3, %v54_v7  ;;  %420 = vmatpush3.bf16.msra.mxu0 %v462_v53  ;;  %439 = vmatprep.subr.bf16.mxu1 %v545_v54  ;;  %v467_v59 = vld [vmem:[#allocation2 + $0x10] sm:$0xff]   ;;  %v468_v60 = vld [vmem:[#allocation2 + $0x8] sm:$0xff]  }
  0x13   :  { %vm123_vm0 = vcmp.lt.s32.totalorder %v594_v42, 32  ;;  %421 = vmatprep.subr.bf16.mxu0 %v545_v54  ;;  %441 = vmatprep.mubr.msk.bf16.mxu1 %vm546_vm1, %v545_v54  ;;  %v469_v61 = vld [vmem:[#allocation2] sm:$0xff]  }
  0x14   :  { %64 = vperm.xlu1 %457, %v38_v3   ;;  %50 = vperm.xlu0 %456, %v38_v3   ;;  %v70_v16 = vrot.slane %v42_v12, %v69_v10  ;;  %v56_v17 = vrot.slane %v42_v12, %v55_v11  ;;  %v86_v18 = vrot.slane %v42_v12, %v85_v13  ;;  %v405_v42 = vld [vmem:[%s627_s4 + $0x2] ss:$0 sm:$0xff] }
  0x15   :  { %v102_v28 = vrot.slane %v42_v12, %v101_v19 }
  0x16   :  { %422 = vmatpush3.bf16.msra.mxu0 %v463_v55 }
  0x17   :  { %423 = vmatprep.subr.bf16.mxu0 %v545_v54 }
  0x18   :  { %459 = vset.pattern.permute.xlu1 %v543_v4  ;;  %458 = vset.pattern.permute.xlu0 %v543_v4 }
  0x19   :  { %80 = vperm.xlu1 %459, %v38_v3   ;;  %76 = vperm.xlu0 %458, %v37_v2  }
  0x1a   :  { %424 = vmatpush3.bf16.msra.mxu0 %v464_v56 }
  0x1b   :  { %425 = vmatprep.subr.bf16.mxu0 %v545_v54 }
  0x1d   :  { %460 = vset.pattern.permute.xlu1 %v544_v5  ;;  %461 = vset.pattern.permute.xlu0 %v544_v5  ;;  %v391_v5 = vld [vmem:[%s625_s2 + $0x1] ss:$0 sm:$0xff] }
  0x1e   :  { %92 = vperm.xlu1 %460, %v37_v2   ;;  %96 = vperm.xlu0 %461, %v38_v3  }
  0x1f   :  { %426 = vmatpush3.bf16.msra.mxu0 %v465_v57 }
  0x20   :  { %427 = vmatprep.subr.bf16.mxu0 %v545_v54 }
  0x23   :  { %428 = vmatpush3.bf16.msra.mxu0 %v466_v58 }
  0x24   :  { %429 = vmatprep.subr.bf16.mxu0 %v545_v54 }
  0x27   :  { %430 = vmatpush3.bf16.msra.mxu0 %v467_v59 }
  0x28   :  { %431 = vmatprep.subr.bf16.mxu0 %v545_v54 }
  0x2b   :  { %432 = vmatpush3.bf16.msra.mxu0 %v468_v60 }
  0x2c   :  { %433 = vmatprep.subr.bf16.mxu0 %v545_v54 }
  0x2f   :  { %434 = vmatpush3.bf16.msra.mxu0 %v469_v61 }
  0x8b   :  { %v61_v8 = vpop.permute.xlu1 %60  ;;  %v46_v9 = vpop.permute.xlu0 %45 }
  0x8c   :  { %v71_v20 = vmul.f32 %v70_v16, %v61_v8  ;;  %v57_v21 = vmul.f32 %v56_v17, %v46_v9  ;;  %v392_v8 = vld [vmem:[%s625_s2 + $0x2] ss:$0 sm:$0xff] }
  0x8e   :  { %v73_v29 = vadd.f32 %v71_v20, %v57_v21 }
  0x8f   :  { %v65_v14 = vpop.permute.xlu1 %64  ;;  %v51_v15 = vpop.permute.xlu0 %50 }
  0x90   :  { %v72_v22 = vmul.f32 %v70_v16, %v65_v14  ;;  %v58_v23 = vmul.f32 %v56_v17, %v51_v15 }
  0x92   :  { %v74_v30 = vadd.f32 %v72_v22, %v58_v23 }
  0x94   :  { %v81_v24 = vpop.permute.xlu1 %80  ;;  %v77_v25 = vpop.permute.xlu0 %76 }
  0x95   :  { %v88_v26 = vmul.f32 %v86_v18, %v81_v24  ;;  %v87_v27 = vmul.f32 %v86_v18, %v77_v25  ;;  %v395_v25 = vld [vmem:[%s627_s4] ss:$0 sm:$0xff] }
  0x97   :  { %v90_v33 = vadd.f32 %v88_v26, %v74_v30  ;;  %v89_v34 = vadd.f32 %v87_v27, %v73_v29 }
  0x99   :  { %v93_v31 = vpop.permute.xlu1 %92  ;;  %v97_v32 = vpop.permute.xlu0 %96 }
  0x9a   :  { %v103_v35 = vmul.f32 %v102_v28, %v93_v31  ;;  %v104_v36 = vmul.f32 %v102_v28, %v97_v32 }
  0x9c   :  { %v105_v38 = vadd.f32 %v103_v35, %v89_v34  ;;  %v106_v39 = vadd.f32 %v104_v36, %v90_v33 }
  0x9e   :  { %v111_v40 = vadd.f32 %v390_v37, %v105_v38  ;;  %v112_v41 = vadd.f32 %v390_v37, %v106_v39 }
  0xa0   :  { %113 = vadd.xlane.f32.xlu1 %v111_v40  ;;  %115 = vadd.xlane.f32.xlu0 %v112_v41 }
 0x129   :  { %v114_v43 = vpop.xlane.xlu1 %113  ;;  %v116_v44 = vpop.xlane.xlu0 %115 }
 0x12a   :  { %v117_v45 = vmul.f32 0.03125, %v114_v43  ;;  %v118_v46 = vmul.f32 0.03125, %v116_v44 }
 0x12c   :  { %v119_v47 = vsub.f32 %v111_v40, %v117_v45  ;;  %v120_v48 = vsub.f32 %v112_v41, %v118_v46 }
 0x12e   :  { %v126_v49 = vsel %vm123_vm0, %v119_v47, 0.0  ;;  %v127_v50 = vsel %vm123_vm0, %v120_v48, 0.0 }
 0x12f   :  { %v128_v51 = vmul.f32 %v126_v49, %v126_v49  ;;  %v129_v52 = vmul.f32 %v127_v50, %v127_v50 }
 0x131   :  { %130 = vadd.xlane.f32.xlu1 %v128_v51  ;;  %132 = vadd.xlane.f32.xlu0 %v129_v52 }
 0x1ba   :  { %v131_v62 = vpop.xlane.xlu1 %130  ;;  %v133_v63 = vpop.xlane.xlu0 %132 }
 0x1bb   :  { %v134_v0 = vmul.f32 0.03125, %v131_v62  ;;  %v135_v1 = vmul.f32 0.03125, %v133_v63 }
 0x1bd   :  { %v136_v2 = vadd.f32 1e-05, %v134_v0  ;;  %v137_v3 = vadd.f32 1e-05, %v135_v1 }
 0x1bf   :  { %470 = vrsqrt.f32 %v136_v2 }
 0x1c0   :  { %472 = vrsqrt.f32 %v137_v3 }
 0x1cc   :  { %v471_v4 = vpop.eup %470 }
 0x1cd   :  { %v473_v6 = vpop.eup %472  ;;  %v140_v7 = vmul.f32 %v471_v4, %v126_v49 }
 0x1ce   :  { %v141_v9 = vmul.f32 %v473_v6, %v127_v50  ;;  %v404_v50 = vld [vmem:[%s627_s4 + $0x1] ss:$0 sm:$0xff]  ;;  %s548_s4 = smov [#allocation5]  }
 0x1cf   :  { %v146_v10 = vmul.f32 %v391_v5, %v140_v7  ;;  %s381_s14 = sshll.u32 %s548_s4, 4  ;;  %s382_s14 = int_to_ptr.vmem [resolvable:$true] %s381_s14 }
 0x1d0   :  { %v147_v11 = vmul.f32 %v391_v5, %v141_v9  ;;  %v547_v5 = vmov 1065369472   ;;  %s514_s15 = scalar_lea.vmem %s382_s14, 16  ;;  %s518_s16 = scalar_lea.vmem %s382_s14, 32 }
 0x1d1   :  { %v152_v12 = vadd.f32 %v392_v8, %v146_v10  ;;  %p515_p5 = scmp.ne.s32.totalorder %s382_s14, %s514_s15  ;;  %p519_p6 = scmp.lt.s32.totalorder %s382_s14, %s382_s14 }
 0x1d2   :  { %v153_v13 = vadd.f32 %v392_v8, %v147_v11  ;;  %p520_p7 = scmp.lt.s32.totalorder %s518_s16, %s514_s15 }
 0x1d3   :  { %v393_v14 = vmul.f32 -1.442695, %v152_v12 }
 0x1d4   :  { %v394_v15 = vmul.f32 -1.442695, %v153_v13  ;;  %p521_p8 = por %p520_p7, %p519_p6 }
 0x1d5   :  { %474 = vpow2.f32 %v393_v14 }
 0x1d6   :  { %476 = vpow2.f32 %v394_v15  ;;  %p522_p9 = pnand %p521_p8, %p515_p5 }
 0x1e2   :  { %v475_v16 = vpop.eup %474 }
 0x1e3   :  { %v477_v17 = vpop.eup %476  ;;  %v160_v18 = vadd.f32 1.0, %v475_v16 }
 0x1e4   :  { %v161_v19 = vadd.f32 1.0, %v477_v17 }
 0x1e5   :  { %478 = vrcp.f32 %v160_v18 }
 0x1e6   :  { %480 = vrcp.f32 %v161_v19 }
 0x1f2   :  { %v479_v20 = vpop.eup %478 }
 0x1f3   :  { %v481_v21 = vpop.eup %480  ;;  %v166_v22 = vmul.f32 %v479_v20, %v152_v12 }
 0x1f4   :  { %v167_v23 = vmul.f32 %v481_v21, %v153_v13 }
 0x1f6   :  { %v171_v24 = vpack.c.bf16 %v167_v23, %v166_v22 }
 0x1f8   :  { %436 = vmatmul.mubr.bf16.vlgmr.msra.gmra.mxu0 %v171_v24 }
 0x2b8   :  { %v274_v26 = vpop.f32.mrf.mxu0 }
 0x2b9   :  { %v275_v27 = vadd.f32 %v395_v25, %v274_v26 }
 0x2ba   :  { %v437_v28 = vpop.f32.mrf.mxu0 }
 0x2bb   :  { %281 = vadd.xlane.f32.xlu1 %v275_v27 }
 0x2bc   :  { %v277_v29 = vpop.f32.mrf.mxu0 }
 0x2bd   :  { %v278_v30 = vadd.f32 %v395_v25, %v277_v29 }
 0x2be   :  { %v438_v31 = vpop.f32.mrf.mxu0 }
 0x2bf   :  { %283 = vadd.xlane.f32.xlu0 %v278_v30 }
 0x344   :  { %v282_v32 = vpop.xlane.xlu1 %281 }
 0x345   :  { %v285_v33 = vmul.f32 0.03125, %v282_v32 }
 0x347   :  { %v287_v34 = vsub.f32 %v275_v27, %v285_v33 }
 0x348   :  { %v284_v35 = vpop.xlane.xlu0 %283 }
 0x349   :  { %v286_v36 = vmul.f32 0.03125, %v284_v35  ;;  %v289_v37 = vsel %vm123_vm0, %v287_v34, 0.0 }
 0x34a   :  { %v291_v38 = vmul.f32 %v289_v37, %v289_v37 }
 0x34b   :  { %v288_v39 = vsub.f32 %v278_v30, %v286_v36 }
 0x34c   :  { %293 = vadd.xlane.f32.xlu1 %v291_v38 }
 0x34d   :  { %v290_v40 = vsel %vm123_vm0, %v288_v39, 0.0 }
 0x34e   :  { %v292_v41 = vmul.f32 %v290_v40, %v290_v40 }
 0x350   :  { %295 = vadd.xlane.f32.xlu0 %v292_v41 }
 0x3d5   :  { %v294_v43 = vpop.xlane.xlu1 %293 }
 0x3d6   :  { %v297_v44 = vmul.f32 0.03125, %v294_v43 }
 0x3d8   :  { %v299_v45 = vadd.f32 1e-05, %v297_v44 }
 0x3d9   :  { %v296_v46 = vpop.xlane.xlu0 %295 }
 0x3da   :  { %482 = vrsqrt.f32 %v299_v45  ;;  %v298_v47 = vmul.f32 0.03125, %v296_v46 }
 0x3dc   :  { %v300_v48 = vadd.f32 1e-05, %v298_v47 }
 0x3de   :  { %484 = vrsqrt.f32 %v300_v48 }
 0x3e7   :  { %v483_v49 = vpop.eup %482 }
 0x3e8   :  { %v303_v51 = vmul.f32 %v483_v49, %v289_v37 }
 0x3ea   :  { %v309_v52 = vmul.f32 %v404_v50, %v303_v51 }
 0x3eb   :  { %v485_v53 = vpop.eup %484 }
 0x3ec   :  { %v304_v54 = vmul.f32 %v485_v53, %v290_v40  ;;  %v315_v55 = vadd.f32 %v405_v42, %v309_v52 }
 0x3ee   :  { %v310_v56 = vmul.f32 %v404_v50, %v304_v54  ;;  %v406_v57 = vmul.f32 -1.442695, %v315_v55 }
 0x3f0   :  { %v316_v58 = vadd.f32 %v405_v42, %v310_v56  ;;  %486 = vpow2.f32 %v406_v57 }
 0x3f2   :  { %v407_v59 = vmul.f32 -1.442695, %v316_v58 }
 0x3f4   :  { %488 = vpow2.f32 %v407_v59 }
 0x3fd   :  { %v487_v60 = vpop.eup %486 }
 0x3fe   :  { %v323_v61 = vadd.f32 1.0, %v487_v60 }
 0x400   :  { %490 = vrcp.f32 %v323_v61 }
 0x401   :  { %v489_v62 = vpop.eup %488 }
 0x402   :  { %v324_v63 = vadd.f32 1.0, %v489_v62 }
 0x404   :  { %492 = vrcp.f32 %v324_v63 }
 0x40d   :  { %v491_v0 = vpop.eup %490 }
 0x40e   :  { %v329_v2 = vmul.f32 %v491_v0, %v315_v55 }
 0x411   :  { %v493_v1 = vpop.eup %492 }
 0x412   :  { %v330_v3 = vmul.f32 %v493_v1, %v316_v58 }
 0x414   :  { %v331_v4 = vpack.c.bf16 %v330_v3, %v329_v2 }
 0x416   :  { %440 = vmatpush3.bf16.xpose.msra.mxu1 %v331_v4 }
 0x41d   :  { %442 = vmatmul.mubr.bf16.vlgmr.msra.gmra.mxu1 %v547_v5 }
 0x4dd   :  { %v366_v6 = vpop.f32.mrf.mxu1 }
 0x4de   :  { %v372_v7 = vmul.f32 0.03125, %v366_v6 }
 0x4df   :  { %v443_v8 = vpop.f32.mrf.mxu1 }
 0x4e0   :  { %374 = vst.msk [vmem:[#allocation5] sm:$0x1] %vm373_vm2, %v372_v7 }
 0x4e1   :  { %v369_v9 = vpop.f32.mrf.mxu1 }
 0x4e2   :  { %525 = shalt.err (!%p522_p9)
}
 0x4e3   :  { %384 = dma.vmem_to_hbm [thread:$0]  %s382_s14, 16, %s628_s5, [#allocation4]   ;;  %v444_v10 = vpop.f32.mrf.mxu1 }
 0x4e4   :  { %536 = dma.done.wait [#allocation4], 16  }
 0x4e5   :  { %537 = vsyncadd [#allocation4], 4294967280 }
 0x4e6   :  { %388 = vsyncpa [#allocation3], 1 }
 0x4e7   :  { %389 = vsyncpa [#allocation4], 1 }

</bundles_post_ra>
